<compile_context>
chip_gen: v7x
topology: tpu7x:2x2x1
jax: 0.10.0
libtpu: 0.0.40
codegen_flags: <defaults>
</compile_context>

<pallas_src>
import functools

import jax
import jax.numpy as jnp
import numpy as np
from jax import lax
from jax.experimental import pallas as pl
from jax.experimental.pallas import tpu as pltpu

_MIB = 1024 * 1024


# ------------------------------- hardware / tiling helpers ------------------------------- #

def _vmem_budget_bytes():
    """Scoped-VMEM budget derived from the chip (v5e/v6e: 128 MiB, v7x: 64 MiB)."""
    cap = 64 * _MIB  # conservative default (v7x floor)
    try:
        info = pltpu.get_tpu_info()
        cap = int(getattr(info, "vmem_capacity_bytes", cap) or cap)
    except Exception:
        pass
    return max(32 * _MIB, min((cap * 3) // 4, 96 * _MIB))


def _pick_tile(dim, target, align):
    """Largest multiple of `align` that divides `dim` and is <= target.
    Falls back to the full dim (block == array dim is always a legal block)."""
    if dim <= target:
        return dim
    c = (target // align) * align
    while c >= align:
        if dim % c == 0:
            return c
        c -= align
    return dim


def _pick_group_width(emb, head_dim, target):
    """Column width of one attention head-group: a multiple of 128 lanes and of
    head_dim that divides emb, as large as possible up to `target`.
    Falls back to the full embedding width (always a legal block)."""
    best = None
    w = 128
    while w <= min(emb, target):
        if emb % w == 0 and w % head_dim == 0:
            best = w
        w += 128
    return best if best is not None else emb


def _block_spec(shape, index_map, *, buffered=None):
    """BlockSpec, optionally requesting deeper pipelining when supported."""
    if buffered is not None:
        try:
            return pl.BlockSpec(shape, index_map, pipeline_mode=pl.Buffered(buffered))
        except Exception:
            pass
    return pl.BlockSpec(shape, index_map)


# --------------------------------- linear ------------------------------------- #

def _linear_kernel(x_ref, w_ref, b_ref, o_ref, acc_ref, *, compute_dtype):
    """One (tm, tn) output tile of y = x @ w + b, accumulated (f32) over the K axis.
    Weights are pre-transposed on the host to (K, N): lane-dense RHS, no in-kernel
    transpose.  Operands are cast to the compute dtype (bf16 on the fast path)."""
    k = pl.program_id(2)

    @pl.when(k == 0)
    def _init():
        acc_ref[...] = jnp.zeros(acc_ref.shape, acc_ref.dtype)

    acc_ref[...] += jnp.dot(
        x_ref[...].astype(compute_dtype),
        w_ref[...].astype(compute_dtype),
        preferred_element_type=jnp.float32)

    @pl.when(k == pl.num_programs(2) - 1)
    def _finalize():
        # Bias added once per output tile (not on every K step).
        o_ref[...] = (acc_ref[...] + b_ref[...].astype(jnp.float32)).astype(o_ref.dtype)


def _linear(x2d, w_t, b, *, compute_dtype, budget, tm=512, tn=512, tk=512):
    """y = x2d @ w_t + b ; x2d: (M, K), w_t: (K, N) (pre-transposed), b: (N,)."""
    M, K = x2d.shape
    K2, N = w_t.shape
    assert K == K2
    sub_align = 16 if jnp.dtype(compute_dtype).itemsize == 2 else 8
    tm = _pick_tile(M, tm, sub_align)
    tn = _pick_tile(N, tn, 128)
    tk = _pick_tile(K, tk, 128)
    grid = (M // tm, N // tn, K // tk)
    itemsize = jnp.dtype(x2d.dtype).itemsize
    cost = pl.CostEstimate(
        flops=2 * M * N * K,
        transcendentals=0,
        bytes_accessed=(M * K + K * N + M * N + N) * itemsize)
    w_spec = _block_spec((tk, tn), lambda i, j, k: (k, j),
                         buffered=3 if grid[2] > 1 else None)
    return pl.pallas_call(
        functools.partial(_linear_kernel, compute_dtype=compute_dtype),
        out_shape=jax.ShapeDtypeStruct((M, N), x2d.dtype),
        grid=grid,
        in_specs=[
            pl.BlockSpec((tm, tk), lambda i, j, k: (i, k)),
            w_spec,
            pl.BlockSpec((1, tn), lambda i, j, k: (0, j)),
        ],
        out_specs=pl.BlockSpec((tm, tn), lambda i, j, k: (i, j)),
        scratch_shapes=[pltpu.VMEM((tm, tn), jnp.float32)],
        compiler_params=pltpu.CompilerParams(
            dimension_semantics=("parallel", "parallel", "arbitrary"),
            vmem_limit_bytes=budget),
        cost_estimate=cost,
    )(x2d, w_t, b.reshape(1, N))


# -------------------------------- attention ----------------------------------- #

def _attn_kernel(q_ref, k_ref, v_ref, o_ref, m_ref, l_ref, acc_ref, *,
                 heads_per_blk, head_dim, compute_dtype):
    """Flash-style attention for one (batch, head-group, q-tile); innermost KV grid
    axis is the online-softmax reduction.  The 1/sqrt(hd) scale is already folded
    into the Q projection, so q is used as-is."""
    kv = pl.program_id(3)

    @pl.when(kv == 0)
    def _init():
        m_ref[...] = jnp.full(m_ref.shape, -jnp.inf, m_ref.dtype)
        l_ref[...] = jnp.zeros(l_ref.shape, l_ref.dtype)
        acc_ref[...] = jnp.zeros(acc_ref.shape, acc_ref.dtype)

    q = q_ref[0].astype(compute_dtype)   # (Tq,  Wg)
    k = k_ref[0].astype(compute_dtype)   # (Tkv, Wg)
    v = v_ref[0].astype(compute_dtype)   # (Tkv, Wg)

    pv_parts = []
    alpha_parts = []
    # Static unroll: Hg is small (<= ~8) whenever a 128-lane-aligned head group exists.
    # TODO(synk): for exotic emb/head_dim combos that hit the Wg==E fallback with many
    # heads, bound this unroll (lax.fori_loop) to avoid vreg-pressure blow-up.
    for h in range(heads_per_blk):
        sl = slice(h * head_dim, (h + 1) * head_dim)
        qh, kh, vh = q[:, sl], k[:, sl], v[:, sl]

        # scores (Tq, Tkv) = qh @ kh.T  — hd contraction on the MXU, K untransposed.
        s = lax.dot_general(qh, kh,
                            dimension_numbers=(((1,), (1,)), ((), ())),
                            preferred_element_type=jnp.float32)

        m_prev = m_ref[h]                                           # (Tq, 1)
        m_new = jnp.maximum(m_prev, jnp.max(s, axis=-1, keepdims=True))
        alpha = jnp.exp(m_prev - m_new)                             # (Tq, 1)
        p = jnp.exp(s - m_new)                                      # (Tq, Tkv) f32

        l_ref[h] = alpha * l_ref[h] + jnp.sum(p, axis=-1, keepdims=True)
        m_ref[h] = m_new

        pv = jnp.dot(p.astype(compute_dtype), vh,
                     preferred_element_type=jnp.float32)            # (Tq, hd)
        pv_parts.append(pv)
        alpha_parts.append(jnp.broadcast_to(alpha, pv.shape))

    # ONE full-width (Tq, Wg) accumulator update per kv step: no per-head
    # sub-128-lane masked read-modify-writes (worst on v5e's single vst slot).
    if heads_per_blk > 1:
        alpha_full = jnp.concatenate(alpha_parts, axis=-1)
        pv_full = jnp.concatenate(pv_parts, axis=-1)
    else:
        alpha_full, pv_full = alpha_parts[0], pv_parts[0]
    acc_ref[...] = alpha_full * acc_ref[...] + pv_full

    @pl.when(kv == pl.num_programs(3) - 1)
    def _finalize():
        tq = acc_ref.shape[0]
        # Exact reciprocal: runs once per q tile, so the cost is negligible and we
        # keep exact parity with the reference softmax normalization.
        inv_parts = [jnp.broadcast_to(1.0 / l_ref[h], (tq, head_dim))
                     for h in range(heads_per_blk)]
        inv_full = (jnp.concatenate(inv_parts, axis=-1)
                    if heads_per_blk > 1 else inv_parts[0])
        # Single lane-dense store, already in merged-heads (B, T, E) layout.
        o_ref[0] = (acc_ref[...] * inv_full).astype(o_ref.dtype)


def _attn_tiles(T, E, hd, itemsize, budget):
    """Pick (Tq, Tkv, Wg) from the per-chip VMEM budget; prefer K/V resident (Tkv==T)."""
    Wg = _pick_group_width(E, hd, 384)
    sub_align = 16 if itemsize == 2 else 8
    tq_target = 1024 if budget >= 80 * _MIB else 512
    Tq = _pick_tile(T, tq_target, sub_align)

    def vmem_cost(tkv):
        kv_bytes = 2 * 2 * tkv * Wg * itemsize        # k + v, double-buffered
        qo_bytes = 2 * 2 * Tq * Wg * itemsize          # q in + out, double-buffered
        scratch = Tq * Wg * 4                          # f32 accumulator
        temps = 3 * Tq * tkv * 4                       # f32 score / exp temporaries
        return kv_bytes + qo_bytes + scratch + temps

    if vmem_cost(T) <= int(budget * 0.7):
        Tkv = T                                        # K/V resident across q tiles
    else:
        Tkv = _pick_tile(T, 512, sub_align)
    return Tq, Tkv, Wg


def _attention(qkv, *, heads, compute_dtype, budget):
    """qkv: (B, T, 3E) fused c_attn output (q | k | v along the last axis)."""
    B, T, E3 = qkv.shape
    E = E3 // 3
    hd = E // heads
    itemsize = jnp.dtype(compute_dtype).itemsize
    Tq, Tkv, Wg = _attn_tiles(T, E, hd, itemsize, budget)
    Hg = Wg // hd
    ngroups = E // Wg

    if Wg % 128 == 0:
        # Lane-aligned head groups: index q/k/v straight into the fused (B,T,3E) slab.
        q_in = k_in = v_in = qkv
        koff, voff = ngroups, 2 * ngroups
    else:
        # Tiny-shape fallback (Wg == E < 128): split on the host so every block's
        # last dim equals the full array dim (always a legal layout).
        q_in, k_in, v_in = qkv[..., :E], qkv[..., E:2 * E], qkv[..., 2 * E:]
        koff = voff = 0

    grid = (B, ngroups, T // Tq, T // Tkv)
    kernel = functools.partial(_attn_kernel, heads_per_blk=Hg, head_dim=hd,
                               compute_dtype=compute_dtype)
    io_itemsize = jnp.dtype(qkv.dtype).itemsize
    cost = pl.CostEstimate(
        flops=4 * B * T * T * E,
        transcendentals=B * heads * T * T,
        bytes_accessed=4 * B * T * E * io_itemsize)
    kv_buffered = 3 if Tkv < T else None

    return pl.pallas_call(
        kernel,
        out_shape=jax.ShapeDtypeStruct((B, T, E), qkv.dtype),
        grid=grid,
        in_specs=[
            pl.BlockSpec((1, Tq, Wg), lambda b, g, qi, kv: (b, qi, g)),
            _block_spec((1, Tkv, Wg), lambda b, g, qi, kv: (b, kv, g + koff),
                        buffered=kv_buffered),
            _block_spec((1, Tkv, Wg), lambda b, g, qi, kv: (b, kv, g + voff),
                        buffered=kv_buffered),
        ],
        out_specs=pl.BlockSpec((1, Tq, Wg), lambda b, g, qi, kv: (b, qi, g)),
        scratch_shapes=[
            pltpu.VMEM((Hg, Tq, 1), jnp.float32),   # running row max
            pltpu.VMEM((Hg, Tq, 1), jnp.float32),   # running softmax denominator
            pltpu.VMEM((Tq, Wg), jnp.float32),      # un-normalized output accumulator
        ],
        compiler_params=pltpu.CompilerParams(
            dimension_semantics=("parallel", "parallel", "parallel", "arbitrary"),
            vmem_limit_bytes=budget),
        cost_estimate=cost,
    )(q_in, k_in, v_in)


# -------------------------------- forward pass --------------------------------- #

def self_attention_gpt2(x, params, heads, compute_dtype=None):
    """Exact re-implementation of SelfAttentionGPT2.forward (mask=False)."""
    B, T, E = x.shape
    assert E % heads == 0
    hd = E // heads
    w_attn, b_attn, w_proj, b_proj = params   # PyTorch layouts: (3E,E), (3E,), (E,E), (E,)

    if compute_dtype is None:
        # bf16 MXU path whenever the activations are bf16; exact f32 otherwise.
        compute_dtype = jnp.bfloat16 if x.dtype == jnp.bfloat16 else x.dtype
    budget = _vmem_budget_bytes()

    # Pre-transpose weights once (lane-dense (K, N) RHS tiles, no in-kernel transpose)
    # and fold the 1/sqrt(hd) softmax scale into the Q projection weights/bias.
    scale = 1.0 / float(hd) ** 0.5
    col_scale = jnp.concatenate(
        [jnp.full((E,), scale, w_attn.dtype), jnp.ones((2 * E,), w_attn.dtype)])
    w_attn_t = w_attn.T * col_scale           # (E, 3E)
    b_attn_s = b_attn * col_scale             # (3E,)
    w_proj_t = w_proj.T                       # (E, E)

    x2d = x.reshape(B * T, E)

    # Single fused c_attn matmul: (B*T, 3E) -> (B, T, 3E).  No per-projection
    # launches, no host split in the lane-aligned case, no head-split transposes.
    qkv = _linear(x2d, w_attn_t, b_attn_s, compute_dtype=compute_dtype,
                  budget=budget).reshape(B, T, 3 * E)

    a = _attention(qkv, heads=heads, compute_dtype=compute_dtype, budget=budget)

    out = _linear(a.reshape(B * T, E), w_proj_t, b_proj,
                  compute_dtype=compute_dtype, budget=budget)
    return out.reshape(B, T, E)


# ------------------------------ pure-JAX reference ------------------------------ #

def _ref_forward(x, params, heads):
    B, T, E = x.shape
    hd = E // heads
    w_attn, b_attn, w_proj, b_proj = params
    qkv = x @ w_attn.T + b_attn
    q, k, v = jnp.split(qkv, 3, axis=2)
    q = q.reshape(B, T, heads, hd).transpose(0, 2, 1, 3)
    k = k.reshape(B, T, heads, hd).transpose(0, 2, 3, 1)
    v = v.reshape(B, T, heads, hd).transpose(0, 2, 1, 3)
    dot = jnp.einsum("bhtd,bhds->bhts", q, k) / float(hd) ** 0.5
    p = jax.nn.softmax(dot, axis=-1)
    a = jnp.einsum("bhts,bhsd->bhtd", p, v)
    a = a.transpose(0, 2, 1, 3).reshape(B, T, E)
    return a @ w_proj.T + b_proj


# ------------------------------------ main -------------------------------------- #

if __name__ == "__main__":
    B, T, E, HEADS = 2, 8, 32, 4

    key = jax.random.PRNGKey(0)
    k_x, k_wa, k_ba, k_wp, k_bp = jax.random.split(key, 5)

    x = jax.random.normal(k_x, (B, T, E), dtype=jnp.float32)
    # PyTorch nn.Linear shapes: weight (out, in), bias (out,)
    w_attn = jax.random.normal(k_wa, (3 * E, E), dtype=jnp.float32) * 0.02
    b_attn = jax.random.normal(k_ba, (3 * E,), dtype=jnp.float32) * 0.02
    w_proj = jax.random.normal(k_wp, (E, E), dtype=jnp.float32) * 0.02
    b_proj = jax.random.normal(k_bp, (E,), dtype=jnp.float32) * 0.02
    params = (w_attn, b_attn, w_proj, b_proj)

    fwd = jax.jit(functools.partial(self_attention_gpt2, heads=HEADS))

    # 1) f32 path: exact (no approximate reciprocal anymore).
    out = jax.block_until_ready(fwd(x, params))
    ref = _ref_forward(x, params, HEADS)
    np.testing.assert_allclose(np.asarray(out), np.asarray(ref), rtol=2e-3, atol=2e-3)

    # 2) bf16 MXU path (the production-perf path on v5e/v6e/v7x): loose tolerance
    #    against an f32 reference evaluated on the bf16-rounded inputs.
    x_bf = x.astype(jnp.bfloat16)
    params_bf = tuple(p.astype(jnp.bfloat16) for p in params)
    out_bf = jax.block_until_ready(fwd(x_bf, params_bf))
    ref_bf = _ref_forward(x_bf.astype(jnp.float32),
                          tuple(p.astype(jnp.float32) for p in params_bf), HEADS)
    np.testing.assert_allclose(np.asarray(out_bf, dtype=np.float32),
                               np.asarray(ref_bf), rtol=1e-1, atol=1e-2)

    print("KERNEL_OK")
</pallas_src>

<mosaic_0001>
module attributes {stable_mosaic.version = 11 : i64} {
  func.func @_linear_kernel(%arg0: i32, %arg1: i32, %arg2: i32, %arg3: memref<16x32xf32, #tpu.memory_space<vmem>>, %arg4: memref<32x96xf32, #tpu.memory_space<vmem>>, %arg5: memref<1x96xf32, #tpu.memory_space<vmem>>, %arg6: memref<16x96xf32, #tpu.memory_space<vmem>>, %arg7: memref<16x96xf32, #tpu.memory_space<vmem>>) attributes {dimension_semantics = [#tpu.dimension_semantics<parallel>, #tpu.dimension_semantics<parallel>, #tpu.dimension_semantics<arbitrary>], iteration_bounds = array<i64: 1, 1, 1>, scalar_prefetch = 0 : i64, scratch_operands = 1 : i64, tpu.core_type = #tpu.core_type<tc>, window_params = [{transform_indices = @transform_0, window_bounds = array<i64: 16, 32>}, {transform_indices = @transform_1, window_bounds = array<i64: 32, 96>}, {transform_indices = @transform_2, window_bounds = array<i64: 1, 96>}, {transform_indices = @transform_3, window_bounds = array<i64: 16, 96>}]} {
    %c0_i32 = arith.constant 0 : i32
    %0 = arith.cmpi eq, %arg2, %c0_i32 : i32
    %1 = arith.extui %0 : i1 to i32
    %c0_i32_0 = arith.constant 0 : i32
    %2 = arith.cmpi ne, %1, %c0_i32_0 : i32
    scf.if %2 {
      %cst_10 = arith.constant 0.000000e+00 : f32
      %12 = vector.broadcast %cst_10 : f32 to vector<16x96xf32>
      %c0_11 = arith.constant 0 : index
      %c0_12 = arith.constant 0 : index
      %13 = vector.load %arg7[%c0_11, %c0_12] : memref<16x96xf32, #tpu.memory_space<vmem>>, vector<16x96xf32>
      tpu.vector_store %arg7[%c0_11, %c0_12], %12 {strides = array<i32>} : memref<16x96xf32, #tpu.memory_space<vmem>>, vector<16x96xf32>,
    } else {
    }
    %c0 = arith.constant 0 : index
    %c0_1 = arith.constant 0 : index
    %3 = vector.load %arg7[%c0, %c0_1] : memref<16x96xf32, #tpu.memory_space<vmem>>, vector<16x96xf32>
    %c0_2 = arith.constant 0 : index
    %c0_3 = arith.constant 0 : index
    %4 = vector.load %arg3[%c0_2, %c0_3] : memref<16x32xf32, #tpu.memory_space<vmem>>, vector<16x32xf32>
    %c0_4 = arith.constant 0 : index
    %c0_5 = arith.constant 0 : index
    %5 = vector.load %arg4[%c0_4, %c0_5] : memref<32x96xf32, #tpu.memory_space<vmem>>, vector<32x96xf32>
    %cst = arith.constant dense<0.000000e+00> : vector<16x96xf32>
    %6 = tpu.matmul %4, %5, %cst {dimension_numbers = #tpu.dot_dimension_numbers<[1], [0], [0], [1], [0, 0, 1, 1], [], []>} : vector<16x32xf32>, vector<32x96xf32>, vector<16x96xf32> -> vector<16x96xf32>
    %7 = arith.addf %3, %6 : vector<16x96xf32>
    %c0_6 = arith.constant 0 : index
    %c0_7 = arith.constant 0 : index
    %8 = vector.load %arg7[%c0_6, %c0_7] : memref<16x96xf32, #tpu.memory_space<vmem>>, vector<16x96xf32>
    tpu.vector_store %arg7[%c0_6, %c0_7], %7 {strides = array<i32>} : memref<16x96xf32, #tpu.memory_space<vmem>>, vector<16x96xf32>,
    %c0_i32_8 = arith.constant 0 : i32
    %9 = arith.cmpi eq, %arg2, %c0_i32_8 : i32
    %10 = arith.extui %9 : i1 to i32
    %c0_i32_9 = arith.constant 0 : i32
    %11 = arith.cmpi ne, %10, %c0_i32_9 : i32
    scf.if %11 {
      %c0_10 = arith.constant 0 : index
      %c0_11 = arith.constant 0 : index
      %12 = vector.load %arg7[%c0_10, %c0_11] : memref<16x96xf32, #tpu.memory_space<vmem>>, vector<16x96xf32>
      %c0_12 = arith.constant 0 : index
      %c0_13 = arith.constant 0 : index
      %13 = vector.load %arg5[%c0_12, %c0_13] : memref<1x96xf32, #tpu.memory_space<vmem>>, vector<1x96xf32>
      %14 = vector.broadcast %13 : vector<1x96xf32> to vector<16x96xf32>
      %15 = arith.addf %12, %14 : vector<16x96xf32>
      %c0_14 = arith.constant 0 : index
      %c0_15 = arith.constant 0 : index
      %16 = vector.load %arg6[%c0_14, %c0_15] : memref<16x96xf32, #tpu.memory_space<vmem>>, vector<16x96xf32>
      tpu.vector_store %arg6[%c0_14, %c0_15], %15 {strides = array<i32>} : memref<16x96xf32, #tpu.memory_space<vmem>>, vector<16x96xf32>,
    } else {
    }
    return
  }
  func.func @transform_0(%arg0: i32, %arg1: i32, %arg2: i32) -> (i32, i32) {
    %c0_i32 = arith.constant 0 : i32
    return %arg0, %arg2 : i32, i32
  }
  func.func @transform_1(%arg0: i32, %arg1: i32, %arg2: i32) -> (i32, i32) {
    %c0_i32 = arith.constant 0 : i32
    return %arg2, %arg1 : i32, i32
  }
  func.func @transform_2(%arg0: i32, %arg1: i32, %arg2: i32) -> (i32, i32) {
    %c0_i32 = arith.constant 0 : i32
    %c0_i32_0 = arith.constant 0 : i32
    return %c0_i32, %arg1 : i32, i32
  }
  func.func @transform_3(%arg0: i32, %arg1: i32, %arg2: i32) -> (i32, i32) {
    %c0_i32 = arith.constant 0 : i32
    return %arg0, %arg1 : i32, i32
  }
}

module attributes {stable_mosaic.version = 11 : i64} {
  func.func @_linear_kernel(%arg0: i32, %arg1: i32, %arg2: i32, %arg3: memref<16x32xf32, #tpu.memory_space<vmem>>, %arg4: memref<32x32xf32, #tpu.memory_space<vmem>>, %arg5: memref<1x32xf32, #tpu.memory_space<vmem>>, %arg6: memref<16x32xf32, #tpu.memory_space<vmem>>, %arg7: memref<16x32xf32, #tpu.memory_space<vmem>>) attributes {dimension_semantics = [#tpu.dimension_semantics<parallel>, #tpu.dimension_semantics<parallel>, #tpu.dimension_semantics<arbitrary>], iteration_bounds = array<i64: 1, 1, 1>, scalar_prefetch = 0 : i64, scratch_operands = 1 : i64, tpu.core_type = #tpu.core_type<tc>, window_params = [{transform_indices = @transform_0, window_bounds = array<i64: 16, 32>}, {transform_indices = @transform_1, window_bounds = array<i64: 32, 32>}, {transform_indices = @transform_2, window_bounds = array<i64: 1, 32>}, {transform_indices = @transform_3, window_bounds = array<i64: 16, 32>}]} {
    %c0_i32 = arith.constant 0 : i32
    %0 = arith.cmpi eq, %arg2, %c0_i32 : i32
    %1 = arith.extui %0 : i1 to i32
    %c0_i32_0 = arith.constant 0 : i32
    %2 = arith.cmpi ne, %1, %c0_i32_0 : i32
    scf.if %2 {
      %cst_10 = arith.constant 0.000000e+00 : f32
      %12 = vector.broadcast %cst_10 : f32 to vector<16x32xf32>
      %c0_11 = arith.constant 0 : index
      %c0_12 = arith.constant 0 : index
      %13 = vector.load %arg7[%c0_11, %c0_12] : memref<16x32xf32, #tpu.memory_space<vmem>>, vector<16x32xf32>
      tpu.vector_store %arg7[%c0_11, %c0_12], %12 {strides = array<i32>} : memref<16x32xf32, #tpu.memory_space<vmem>>, vector<16x32xf32>,
    } else {
    }
    %c0 = arith.constant 0 : index
    %c0_1 = arith.constant 0 : index
    %3 = vector.load %arg7[%c0, %c0_1] : memref<16x32xf32, #tpu.memory_space<vmem>>, vector<16x32xf32>
    %c0_2 = arith.constant 0 : index
    %c0_3 = arith.constant 0 : index
    %4 = vector.load %arg3[%c0_2, %c0_3] : memref<16x32xf32, #tpu.memory_space<vmem>>, vector<16x32xf32>
    %c0_4 = arith.constant 0 : index
    %c0_5 = arith.constant 0 : index
    %5 = vector.load %arg4[%c0_4, %c0_5] : memref<32x32xf32, #tpu.memory_space<vmem>>, vector<32x32xf32>
    %cst = arith.constant dense<0.000000e+00> : vector<16x32xf32>
    %6 = tpu.matmul %4, %5, %cst {dimension_numbers = #tpu.dot_dimension_numbers<[1], [0], [0], [1], [0, 0, 1, 1], [], []>} : vector<16x32xf32>, vector<32x32xf32>, vector<16x32xf32> -> vector<16x32xf32>
    %7 = arith.addf %3, %6 : vector<16x32xf32>
    %c0_6 = arith.constant 0 : index
    %c0_7 = arith.constant 0 : index
    %8 = vector.load %arg7[%c0_6, %c0_7] : memref<16x32xf32, #tpu.memory_space<vmem>>, vector<16x32xf32>
    tpu.vector_store %arg7[%c0_6, %c0_7], %7 {strides = array<i32>} : memref<16x32xf32, #tpu.memory_space<vmem>>, vector<16x32xf32>,
    %c0_i32_8 = arith.constant 0 : i32
    %9 = arith.cmpi eq, %arg2, %c0_i32_8 : i32
    %10 = arith.extui %9 : i1 to i32
    %c0_i32_9 = arith.constant 0 : i32
    %11 = arith.cmpi ne, %10, %c0_i32_9 : i32
    scf.if %11 {
      %c0_10 = arith.constant 0 : index
      %c0_11 = arith.constant 0 : index
      %12 = vector.load %arg7[%c0_10, %c0_11] : memref<16x32xf32, #tpu.memory_space<vmem>>, vector<16x32xf32>
      %c0_12 = arith.constant 0 : index
      %c0_13 = arith.constant 0 : index
      %13 = vector.load %arg5[%c0_12, %c0_13] : memref<1x32xf32, #tpu.memory_space<vmem>>, vector<1x32xf32>
      %14 = vector.broadcast %13 : vector<1x32xf32> to vector<16x32xf32>
      %15 = arith.addf %12, %14 : vector<16x32xf32>
      %c0_14 = arith.constant 0 : index
      %c0_15 = arith.constant 0 : index
      %16 = vector.load %arg6[%c0_14, %c0_15] : memref<16x32xf32, #tpu.memory_space<vmem>>, vector<16x32xf32>
      tpu.vector_store %arg6[%c0_14, %c0_15], %15 {strides = array<i32>} : memref<16x32xf32, #tpu.memory_space<vmem>>, vector<16x32xf32>,
    } else {
    }
    return
  }
  func.func @transform_0(%arg0: i32, %arg1: i32, %arg2: i32) -> (i32, i32) {
    %c0_i32 = arith.constant 0 : i32
    return %arg0, %arg2 : i32, i32
  }
  func.func @transform_1(%arg0: i32, %arg1: i32, %arg2: i32) -> (i32, i32) {
    %c0_i32 = arith.constant 0 : i32
    return %arg2, %arg1 : i32, i32
  }
  func.func @transform_2(%arg0: i32, %arg1: i32, %arg2: i32) -> (i32, i32) {
    %c0_i32 = arith.constant 0 : i32
    %c0_i32_0 = arith.constant 0 : i32
    return %c0_i32, %arg1 : i32, i32
  }
  func.func @transform_3(%arg0: i32, %arg1: i32, %arg2: i32) -> (i32, i32) {
    %c0_i32 = arith.constant 0 : i32
    return %arg0, %arg1 : i32, i32
  }
}

module attributes {stable_mosaic.version = 11 : i64} {
  func.func @_attn_kernel(%arg0: i32, %arg1: i32, %arg2: i32, %arg3: i32, %arg4: memref<1x8x32xf32, #tpu.memory_space<vmem>>, %arg5: memref<1x8x32xf32, #tpu.memory_space<vmem>>, %arg6: memref<1x8x32xf32, #tpu.memory_space<vmem>>, %arg7: memref<1x8x32xf32, #tpu.memory_space<vmem>>, %arg8: memref<4x8x1xf32, #tpu.memory_space<vmem>>, %arg9: memref<4x8x1xf32, #tpu.memory_space<vmem>>, %arg10: memref<8x32xf32, #tpu.memory_space<vmem>>) attributes {dimension_semantics = [#tpu.dimension_semantics<parallel>, #tpu.dimension_semantics<parallel>, #tpu.dimension_semantics<parallel>, #tpu.dimension_semantics<arbitrary>], iteration_bounds = array<i64: 2, 1, 1, 1>, scalar_prefetch = 0 : i64, scratch_operands = 3 : i64, tpu.core_type = #tpu.core_type<tc>, window_params = [{transform_indices = @transform_0, window_bounds = array<i64: 1, 8, 32>}, {transform_indices = @transform_1, window_bounds = array<i64: 1, 8, 32>}, {transform_indices = @transform_2, window_bounds = array<i64: 1, 8, 32>}, {transform_indices = @transform_3, window_bounds = array<i64: 1, 8, 32>}]} {
    %c0_i32 = arith.constant 0 : i32
    %0 = arith.cmpi eq, %arg3, %c0_i32 : i32
    %1 = arith.extui %0 : i1 to i32
    %c0_i32_0 = arith.constant 0 : i32
    %2 = arith.cmpi ne, %1, %c0_i32_0 : i32
    scf.if %2 {
      %cst_75 = arith.constant 0xFF800000 : f32
      %134 = vector.broadcast %cst_75 : f32 to vector<4x8x1xf32>
      %c0_76 = arith.constant 0 : index
      %c0_77 = arith.constant 0 : index
      %c0_78 = arith.constant 0 : index
      %135 = vector.load %arg8[%c0_76, %c0_77, %c0_78] : memref<4x8x1xf32, #tpu.memory_space<vmem>>, vector<4x8x1xf32>
      tpu.vector_store %arg8[%c0_76, %c0_77, %c0_78], %134 {strides = array<i32>} : memref<4x8x1xf32, #tpu.memory_space<vmem>>, vector<4x8x1xf32>,
      %cst_79 = arith.constant 0.000000e+00 : f32
      %136 = vector.broadcast %cst_79 : f32 to vector<4x8x1xf32>
      %c0_80 = arith.constant 0 : index
      %c0_81 = arith.constant 0 : index
      %c0_82 = arith.constant 0 : index
      %137 = vector.load %arg9[%c0_80, %c0_81, %c0_82] : memref<4x8x1xf32, #tpu.memory_space<vmem>>, vector<4x8x1xf32>
      tpu.vector_store %arg9[%c0_80, %c0_81, %c0_82], %136 {strides = array<i32>} : memref<4x8x1xf32, #tpu.memory_space<vmem>>, vector<4x8x1xf32>,
      %cst_83 = arith.constant 0.000000e+00 : f32
      %138 = vector.broadcast %cst_83 : f32 to vector<8x32xf32>
      %c0_84 = arith.constant 0 : index
      %c0_85 = arith.constant 0 : index
      %139 = vector.load %arg10[%c0_84, %c0_85] : memref<8x32xf32, #tpu.memory_space<vmem>>, vector<8x32xf32>
      tpu.vector_store %arg10[%c0_84, %c0_85], %138 {strides = array<i32>} : memref<8x32xf32, #tpu.memory_space<vmem>>, vector<8x32xf32>,
    } else {
    }
    %c0 = arith.constant 0 : index
    %c0_1 = arith.constant 0 : index
    %c0_2 = arith.constant 0 : index
    %3 = vector.load %arg4[%c0, %c0_1, %c0_2] : memref<1x8x32xf32, #tpu.memory_space<vmem>>, vector<1x8x32xf32>
    %4 = vector.shape_cast %3 : vector<1x8x32xf32> to vector<8x32xf32>
    %c0_3 = arith.constant 0 : index
    %c0_4 = arith.constant 0 : index
    %c0_5 = arith.constant 0 : index
    %5 = vector.load %arg5[%c0_3, %c0_4, %c0_5] : memref<1x8x32xf32, #tpu.memory_space<vmem>>, vector<1x8x32xf32>
    %6 = vector.shape_cast %5 : vector<1x8x32xf32> to vector<8x32xf32>
    %c0_6 = arith.constant 0 : index
    %c0_7 = arith.constant 0 : index
    %c0_8 = arith.constant 0 : index
    %7 = vector.load %arg6[%c0_6, %c0_7, %c0_8] : memref<1x8x32xf32, #tpu.memory_space<vmem>>, vector<1x8x32xf32>
    %8 = vector.shape_cast %7 : vector<1x8x32xf32> to vector<8x32xf32>
    %9 = vector.extract_strided_slice %4 {offsets = [0, 0], sizes = [8, 8], strides = [1, 1]} : vector<8x32xf32> to vector<8x8xf32>
    %10 = vector.extract_strided_slice %6 {offsets = [0, 0], sizes = [8, 8], strides = [1, 1]} : vector<8x32xf32> to vector<8x8xf32>
    %11 = vector.extract_strided_slice %8 {offsets = [0, 0], sizes = [8, 8], strides = [1, 1]} : vector<8x32xf32> to vector<8x8xf32>
    %cst = arith.constant dense<0.000000e+00> : vector<8x8xf32>
    %12 = tpu.matmul %9, %10, %cst {dimension_numbers = #tpu.dot_dimension_numbers<[1], [1], [0], [0], [0, 0, 1, 0], [], []>} : vector<8x8xf32>, vector<8x8xf32>, vector<8x8xf32> -> vector<8x8xf32>
    %c0_9 = arith.constant 0 : index
    %c0_10 = arith.constant 0 : index
    %c0_11 = arith.constant 0 : index
    %13 = vector.load %arg8[%c0_9, %c0_10, %c0_11] : memref<4x8x1xf32, #tpu.memory_space<vmem>>, vector<1x8x1xf32>
    %14 = vector.shape_cast %13 : vector<1x8x1xf32> to vector<8x1xf32>
    %cst_12 = arith.constant dense<0xFF800000> : vector<8xf32>
    %15 = vector.multi_reduction <maximumf>, %12, %cst_12 [1] : vector<8x8xf32> to vector<8xf32>
    %16 = vector.shape_cast %15 : vector<8xf32> to vector<8x1xf32>
    %17 = arith.maximumf %14, %16 : vector<8x1xf32>
    %18 = arith.subf %14, %17 : vector<8x1xf32>
    %19 = math.exp %18 : vector<8x1xf32>
    %20 = vector.broadcast %17 : vector<8x1xf32> to vector<8x8xf32>
    %21 = arith.subf %12, %20 : vector<8x8xf32>
    %22 = math.exp %21 : vector<8x8xf32>
    %c0_13 = arith.constant 0 : index
    %c0_14 = arith.constant 0 : index
    %c0_15 = arith.constant 0 : index
    %23 = vector.load %arg9[%c0_13, %c0_14, %c0_15] : memref<4x8x1xf32, #tpu.memory_space<vmem>>, vector<1x8x1xf32>
    %24 = vector.shape_cast %23 : vector<1x8x1xf32> to vector<8x1xf32>
    %25 = arith.mulf %19, %24 : vector<8x1xf32>
    %cst_16 = arith.constant dense<0.000000e+00> : vector<8xf32>
    %26 = vector.multi_reduction <add>, %22, %cst_16 [1] : vector<8x8xf32> to vector<8xf32>
    %27 = vector.shape_cast %26 : vector<8xf32> to vector<8x1xf32>
    %28 = arith.addf %25, %27 : vector<8x1xf32>
    %c0_17 = arith.constant 0 : index
    %c0_18 = arith.constant 0 : index
    %c0_19 = arith.constant 0 : index
    %29 = vector.load %arg9[%c0_17, %c0_18, %c0_19] : memref<4x8x1xf32, #tpu.memory_space<vmem>>, vector<1x8x1xf32>
    %30 = vector.shape_cast %29 : vector<1x8x1xf32> to vector<8x1xf32>
    %31 = vector.shape_cast %28 : vector<8x1xf32> to vector<1x8x1xf32>
    tpu.vector_store %arg9[%c0_17, %c0_18, %c0_19], %31 {strides = array<i32>} : memref<4x8x1xf32, #tpu.memory_space<vmem>>, vector<1x8x1xf32>,
    %c0_20 = arith.constant 0 : index
    %c0_21 = arith.constant 0 : index
    %c0_22 = arith.constant 0 : index
    %32 = vector.load %arg8[%c0_20, %c0_21, %c0_22] : memref<4x8x1xf32, #tpu.memory_space<vmem>>, vector<1x8x1xf32>
    %33 = vector.shape_cast %32 : vector<1x8x1xf32> to vector<8x1xf32>
    %34 = vector.shape_cast %17 : vector<8x1xf32> to vector<1x8x1xf32>
    tpu.vector_store %arg8[%c0_20, %c0_21, %c0_22], %34 {strides = array<i32>} : memref<4x8x1xf32, #tpu.memory_space<vmem>>, vector<1x8x1xf32>,
    %cst_23 = arith.constant dense<0.000000e+00> : vector<8x8xf32>
    %35 = tpu.matmul %22, %11, %cst_23 {dimension_numbers = #tpu.dot_dimension_numbers<[1], [0], [0], [1], [0, 0, 1, 1], [], []>} : vector<8x8xf32>, vector<8x8xf32>, vector<8x8xf32> -> vector<8x8xf32>
    %36 = vector.shape_cast %19 : vector<8x1xf32> to vector<8x1xf32>
    %37 = vector.broadcast %36 : vector<8x1xf32> to vector<8x8xf32>
    %38 = vector.extract_strided_slice %4 {offsets = [0, 8], sizes = [8, 8], strides = [1, 1]} : vector<8x32xf32> to vector<8x8xf32>
    %39 = vector.extract_strided_slice %6 {offsets = [0, 8], sizes = [8, 8], strides = [1, 1]} : vector<8x32xf32> to vector<8x8xf32>
    %40 = vector.extract_strided_slice %8 {offsets = [0, 8], sizes = [8, 8], strides = [1, 1]} : vector<8x32xf32> to vector<8x8xf32>
    %cst_24 = arith.constant dense<0.000000e+00> : vector<8x8xf32>
    %41 = tpu.matmul %38, %39, %cst_24 {dimension_numbers = #tpu.dot_dimension_numbers<[1], [1], [0], [0], [0, 0, 1, 0], [], []>} : vector<8x8xf32>, vector<8x8xf32>, vector<8x8xf32> -> vector<8x8xf32>
    %c1 = arith.constant 1 : index
    %c0_25 = arith.constant 0 : index
    %c0_26 = arith.constant 0 : index
    %42 = vector.load %arg8[%c1, %c0_25, %c0_26] : memref<4x8x1xf32, #tpu.memory_space<vmem>>, vector<1x8x1xf32>
    %43 = vector.shape_cast %42 : vector<1x8x1xf32> to vector<8x1xf32>
    %cst_27 = arith.constant dense<0xFF800000> : vector<8xf32>
    %44 = vector.multi_reduction <maximumf>, %41, %cst_27 [1] : vector<8x8xf32> to vector<8xf32>
    %45 = vector.shape_cast %44 : vector<8xf32> to vector<8x1xf32>
    %46 = arith.maximumf %43, %45 : vector<8x1xf32>
    %47 = arith.subf %43, %46 : vector<8x1xf32>
    %48 = math.exp %47 : vector<8x1xf32>
    %49 = vector.broadcast %46 : vector<8x1xf32> to vector<8x8xf32>
    %50 = arith.subf %41, %49 : vector<8x8xf32>
    %51 = math.exp %50 : vector<8x8xf32>
    %c1_28 = arith.constant 1 : index
    %c0_29 = arith.constant 0 : index
    %c0_30 = arith.constant 0 : index
    %52 = vector.load %arg9[%c1_28, %c0_29, %c0_30] : memref<4x8x1xf32, #tpu.memory_space<vmem>>, vector<1x8x1xf32>
    %53 = vector.shape_cast %52 : vector<1x8x1xf32> to vector<8x1xf32>
    %54 = arith.mulf %48, %53 : vector<8x1xf32>
    %cst_31 = arith.constant dense<0.000000e+00> : vector<8xf32>
    %55 = vector.multi_reduction <add>, %51, %cst_31 [1] : vector<8x8xf32> to vector<8xf32>
    %56 = vector.shape_cast %55 : vector<8xf32> to vector<8x1xf32>
    %57 = arith.addf %54, %56 : vector<8x1xf32>
    %c1_32 = arith.constant 1 : index
    %c0_33 = arith.constant 0 : index
    %c0_34 = arith.constant 0 : index
    %58 = vector.load %arg9[%c1_32, %c0_33, %c0_34] : memref<4x8x1xf32, #tpu.memory_space<vmem>>, vector<1x8x1xf32>
    %59 = vector.shape_cast %58 : vector<1x8x1xf32> to vector<8x1xf32>
    %60 = vector.shape_cast %57 : vector<8x1xf32> to vector<1x8x1xf32>
    tpu.vector_store %arg9[%c1_32, %c0_33, %c0_34], %60 {strides = array<i32>} : memref<4x8x1xf32, #tpu.memory_space<vmem>>, vector<1x8x1xf32>,
    %c1_35 = arith.constant 1 : index
    %c0_36 = arith.constant 0 : index
    %c0_37 = arith.constant 0 : index
    %61 = vector.load %arg8[%c1_35, %c0_36, %c0_37] : memref<4x8x1xf32, #tpu.memory_space<vmem>>, vector<1x8x1xf32>
    %62 = vector.shape_cast %61 : vector<1x8x1xf32> to vector<8x1xf32>
    %63 = vector.shape_cast %46 : vector<8x1xf32> to vector<1x8x1xf32>
    tpu.vector_store %arg8[%c1_35, %c0_36, %c0_37], %63 {strides = array<i32>} : memref<4x8x1xf32, #tpu.memory_space<vmem>>, vector<1x8x1xf32>,
    %cst_38 = arith.constant dense<0.000000e+00> : vector<8x8xf32>
    %64 = tpu.matmul %51, %40, %cst_38 {dimension_numbers = #tpu.dot_dimension_numbers<[1], [0], [0], [1], [0, 0, 1, 1], [], []>} : vector<8x8xf32>, vector<8x8xf32>, vector<8x8xf32> -> vector<8x8xf32>
    %65 = vector.shape_cast %48 : vector<8x1xf32> to vector<8x1xf32>
    %66 = vector.broadcast %65 : vector<8x1xf32> to vector<8x8xf32>
    %67 = vector.extract_strided_slice %4 {offsets = [0, 16], sizes = [8, 8], strides = [1, 1]} : vector<8x32xf32> to vector<8x8xf32>
    %68 = vector.extract_strided_slice %6 {offsets = [0, 16], sizes = [8, 8], strides = [1, 1]} : vector<8x32xf32> to vector<8x8xf32>
    %69 = vector.extract_strided_slice %8 {offsets = [0, 16], sizes = [8, 8], strides = [1, 1]} : vector<8x32xf32> to vector<8x8xf32>
    %cst_39 = arith.constant dense<0.000000e+00> : vector<8x8xf32>
    %70 = tpu.matmul %67, %68, %cst_39 {dimension_numbers = #tpu.dot_dimension_numbers<[1], [1], [0], [0], [0, 0, 1, 0], [], []>} : vector<8x8xf32>, vector<8x8xf32>, vector<8x8xf32> -> vector<8x8xf32>
    %c2 = arith.constant 2 : index
    %c0_40 = arith.constant 0 : index
    %c0_41 = arith.constant 0 : index
    %71 = vector.load %arg8[%c2, %c0_40, %c0_41] : memref<4x8x1xf32, #tpu.memory_space<vmem>>, vector<1x8x1xf32>
    %72 = vector.shape_cast %71 : vector<1x8x1xf32> to vector<8x1xf32>
    %cst_42 = arith.constant dense<0xFF800000> : vector<8xf32>
    %73 = vector.multi_reduction <maximumf>, %70, %cst_42 [1] : vector<8x8xf32> to vector<8xf32>
    %74 = vector.shape_cast %73 : vector<8xf32> to vector<8x1xf32>
    %75 = arith.maximumf %72, %74 : vector<8x1xf32>
    %76 = arith.subf %72, %75 : vector<8x1xf32>
    %77 = math.exp %76 : vector<8x1xf32>
    %78 = vector.broadcast %75 : vector<8x1xf32> to vector<8x8xf32>
    %79 = arith.subf %70, %78 : vector<8x8xf32>
    %80 = math.exp %79 : vector<8x8xf32>
    %c2_43 = arith.constant 2 : index
    %c0_44 = arith.constant 0 : index
    %c0_45 = arith.constant 0 : index
    %81 = vector.load %arg9[%c2_43, %c0_44, %c0_45] : memref<4x8x1xf32, #tpu.memory_space<vmem>>, vector<1x8x1xf32>
    %82 = vector.shape_cast %81 : vector<1x8x1xf32> to vector<8x1xf32>
    %83 = arith.mulf %77, %82 : vector<8x1xf32>
    %cst_46 = arith.constant dense<0.000000e+00> : vector<8xf32>
    %84 = vector.multi_reduction <add>, %80, %cst_46 [1] : vector<8x8xf32> to vector<8xf32>
    %85 = vector.shape_cast %84 : vector<8xf32> to vector<8x1xf32>
    %86 = arith.addf %83, %85 : vector<8x1xf32>
    %c2_47 = arith.constant 2 : index
    %c0_48 = arith.constant 0 : index
    %c0_49 = arith.constant 0 : index
    %87 = vector.load %arg9[%c2_47, %c0_48, %c0_49] : memref<4x8x1xf32, #tpu.memory_space<vmem>>, vector<1x8x1xf32>
    %88 = vector.shape_cast %87 : vector<1x8x1xf32> to vector<8x1xf32>
    %89 = vector.shape_cast %86 : vector<8x1xf32> to vector<1x8x1xf32>
    tpu.vector_store %arg9[%c2_47, %c0_48, %c0_49], %89 {strides = array<i32>} : memref<4x8x1xf32, #tpu.memory_space<vmem>>, vector<1x8x1xf32>,
    %c2_50 = arith.constant 2 : index
    %c0_51 = arith.constant 0 : index
    %c0_52 = arith.constant 0 : index
    %90 = vector.load %arg8[%c2_50, %c0_51, %c0_52] : memref<4x8x1xf32, #tpu.memory_space<vmem>>, vector<1x8x1xf32>
    %91 = vector.shape_cast %90 : vector<1x8x1xf32> to vector<8x1xf32>
    %92 = vector.shape_cast %75 : vector<8x1xf32> to vector<1x8x1xf32>
    tpu.vector_store %arg8[%c2_50, %c0_51, %c0_52], %92 {strides = array<i32>} : memref<4x8x1xf32, #tpu.memory_space<vmem>>, vector<1x8x1xf32>,
    %cst_53 = arith.constant dense<0.000000e+00> : vector<8x8xf32>
    %93 = tpu.matmul %80, %69, %cst_53 {dimension_numbers = #tpu.dot_dimension_numbers<[1], [0], [0], [1], [0, 0, 1, 1], [], []>} : vector<8x8xf32>, vector<8x8xf32>, vector<8x8xf32> -> vector<8x8xf32>
    %94 = vector.shape_cast %77 : vector<8x1xf32> to vector<8x1xf32>
    %95 = vector.broadcast %94 : vector<8x1xf32> to vector<8x8xf32>
    %96 = vector.extract_strided_slice %4 {offsets = [0, 24], sizes = [8, 8], strides = [1, 1]} : vector<8x32xf32> to vector<8x8xf32>
    %97 = vector.extract_strided_slice %6 {offsets = [0, 24], sizes = [8, 8], strides = [1, 1]} : vector<8x32xf32> to vector<8x8xf32>
    %98 = vector.extract_strided_slice %8 {offsets = [0, 24], sizes = [8, 8], strides = [1, 1]} : vector<8x32xf32> to vector<8x8xf32>
    %cst_54 = arith.constant dense<0.000000e+00> : vector<8x8xf32>
    %99 = tpu.matmul %96, %97, %cst_54 {dimension_numbers = #tpu.dot_dimension_numbers<[1], [1], [0], [0], [0, 0, 1, 0], [], []>} : vector<8x8xf32>, vector<8x8xf32>, vector<8x8xf32> -> vector<8x8xf32>
    %c3 = arith.constant 3 : index
    %c0_55 = arith.constant 0 : index
    %c0_56 = arith.constant 0 : index
    %100 = vector.load %arg8[%c3, %c0_55, %c0_56] : memref<4x8x1xf32, #tpu.memory_space<vmem>>, vector<1x8x1xf32>
    %101 = vector.shape_cast %100 : vector<1x8x1xf32> to vector<8x1xf32>
    %cst_57 = arith.constant dense<0xFF800000> : vector<8xf32>
    %102 = vector.multi_reduction <maximumf>, %99, %cst_57 [1] : vector<8x8xf32> to vector<8xf32>
    %103 = vector.shape_cast %102 : vector<8xf32> to vector<8x1xf32>
    %104 = arith.maximumf %101, %103 : vector<8x1xf32>
    %105 = arith.subf %101, %104 : vector<8x1xf32>
    %106 = math.exp %105 : vector<8x1xf32>
    %107 = vector.broadcast %104 : vector<8x1xf32> to vector<8x8xf32>
    %108 = arith.subf %99, %107 : vector<8x8xf32>
    %109 = math.exp %108 : vector<8x8xf32>
    %c3_58 = arith.constant 3 : index
    %c0_59 = arith.constant 0 : index
    %c0_60 = arith.constant 0 : index
    %110 = vector.load %arg9[%c3_58, %c0_59, %c0_60] : memref<4x8x1xf32, #tpu.memory_space<vmem>>, vector<1x8x1xf32>
    %111 = vector.shape_cast %110 : vector<1x8x1xf32> to vector<8x1xf32>
    %112 = arith.mulf %106, %111 : vector<8x1xf32>
    %cst_61 = arith.constant dense<0.000000e+00> : vector<8xf32>
    %113 = vector.multi_reduction <add>, %109, %cst_61 [1] : vector<8x8xf32> to vector<8xf32>
    %114 = vector.shape_cast %113 : vector<8xf32> to vector<8x1xf32>
    %115 = arith.addf %112, %114 : vector<8x1xf32>
    %c3_62 = arith.constant 3 : index
    %c0_63 = arith.constant 0 : index
    %c0_64 = arith.constant 0 : index
    %116 = vector.load %arg9[%c3_62, %c0_63, %c0_64] : memref<4x8x1xf32, #tpu.memory_space<vmem>>, vector<1x8x1xf32>
    %117 = vector.shape_cast %116 : vector<1x8x1xf32> to vector<8x1xf32>
    %118 = vector.shape_cast %115 : vector<8x1xf32> to vector<1x8x1xf32>
    tpu.vector_store %arg9[%c3_62, %c0_63, %c0_64], %118 {strides = array<i32>} : memref<4x8x1xf32, #tpu.memory_space<vmem>>, vector<1x8x1xf32>,
    %c3_65 = arith.constant 3 : index
    %c0_66 = arith.constant 0 : index
    %c0_67 = arith.constant 0 : index
    %119 = vector.load %arg8[%c3_65, %c0_66, %c0_67] : memref<4x8x1xf32, #tpu.memory_space<vmem>>, vector<1x8x1xf32>
    %120 = vector.shape_cast %119 : vector<1x8x1xf32> to vector<8x1xf32>
    %121 = vector.shape_cast %104 : vector<8x1xf32> to vector<1x8x1xf32>
    tpu.vector_store %arg8[%c3_65, %c0_66, %c0_67], %121 {strides = array<i32>} : memref<4x8x1xf32, #tpu.memory_space<vmem>>, vector<1x8x1xf32>,
    %cst_68 = arith.constant dense<0.000000e+00> : vector<8x8xf32>
    %122 = tpu.matmul %109, %98, %cst_68 {dimension_numbers = #tpu.dot_dimension_numbers<[1], [0], [0], [1], [0, 0, 1, 1], [], []>} : vector<8x8xf32>, vector<8x8xf32>, vector<8x8xf32> -> vector<8x8xf32>
    %123 = vector.shape_cast %106 : vector<8x1xf32> to vector<8x1xf32>
    %124 = vector.broadcast %123 : vector<8x1xf32> to vector<8x8xf32>
    %125 = tpu.concatenate %37, %66, %95, %124 in 1 : vector<8x8xf32>, vector<8x8xf32>, vector<8x8xf32>, vector<8x8xf32> -> vector<8x32xf32>
    %126 = tpu.concatenate %35, %64, %93, %122 in 1 : vector<8x8xf32>, vector<8x8xf32>, vector<8x8xf32>, vector<8x8xf32> -> vector<8x32xf32>
    %c0_69 = arith.constant 0 : index
    %c0_70 = arith.constant 0 : index
    %127 = vector.load %arg10[%c0_69, %c0_70] : memref<8x32xf32, #tpu.memory_space<vmem>>, vector<8x32xf32>
    %128 = arith.mulf %125, %127 : vector<8x32xf32>
    %129 = arith.addf %128, %126 : vector<8x32xf32>
    %c0_71 = arith.constant 0 : index
    %c0_72 = arith.constant 0 : index
    %130 = vector.load %arg10[%c0_71, %c0_72] : memref<8x32xf32, #tpu.memory_space<vmem>>, vector<8x32xf32>
    tpu.vector_store %arg10[%c0_71, %c0_72], %129 {strides = array<i32>} : memref<8x32xf32, #tpu.memory_space<vmem>>, vector<8x32xf32>,
    %c0_i32_73 = arith.constant 0 : i32
    %131 = arith.cmpi eq, %arg3, %c0_i32_73 : i32
    %132 = arith.extui %131 : i1 to i32
    %c0_i32_74 = arith.constant 0 : i32
    %133 = arith.cmpi ne, %132, %c0_i32_74 : i32
    scf.if %133 {
      %c0_75 = arith.constant 0 : index
      %c0_76 = arith.constant 0 : index
      %c0_77 = arith.constant 0 : index
      %134 = vector.load %arg9[%c0_75, %c0_76, %c0_77] : memref<4x8x1xf32, #tpu.memory_space<vmem>>, vector<1x8x1xf32>
      %135 = vector.shape_cast %134 : vector<1x8x1xf32> to vector<8x1xf32>
      %cst_78 = arith.constant 1.000000e+00 : f32
      %136 = vector.broadcast %cst_78 : f32 to vector<8x1xf32>
      %137 = arith.divf %136, %135 : vector<8x1xf32>
      %138 = vector.shape_cast %137 : vector<8x1xf32> to vector<8x1xf32>
      %139 = vector.broadcast %138 : vector<8x1xf32> to vector<8x8xf32>
      %c1_79 = arith.constant 1 : index
      %c0_80 = arith.constant 0 : index
      %c0_81 = arith.constant 0 : index
      %140 = vector.load %arg9[%c1_79, %c0_80, %c0_81] : memref<4x8x1xf32, #tpu.memory_space<vmem>>, vector<1x8x1xf32>
      %141 = vector.shape_cast %140 : vector<1x8x1xf32> to vector<8x1xf32>
      %cst_82 = arith.constant 1.000000e+00 : f32
      %142 = vector.broadcast %cst_82 : f32 to vector<8x1xf32>
      %143 = arith.divf %142, %141 : vector<8x1xf32>
      %144 = vector.shape_cast %143 : vector<8x1xf32> to vector<8x1xf32>
      %145 = vector.broadcast %144 : vector<8x1xf32> to vector<8x8xf32>
      %c2_83 = arith.constant 2 : index
      %c0_84 = arith.constant 0 : index
      %c0_85 = arith.constant 0 : index
      %146 = vector.load %arg9[%c2_83, %c0_84, %c0_85] : memref<4x8x1xf32, #tpu.memory_space<vmem>>, vector<1x8x1xf32>
      %147 = vector.shape_cast %146 : vector<1x8x1xf32> to vector<8x1xf32>
      %cst_86 = arith.constant 1.000000e+00 : f32
      %148 = vector.broadcast %cst_86 : f32 to vector<8x1xf32>
      %149 = arith.divf %148, %147 : vector<8x1xf32>
      %150 = vector.shape_cast %149 : vector<8x1xf32> to vector<8x1xf32>
      %151 = vector.broadcast %150 : vector<8x1xf32> to vector<8x8xf32>
      %c3_87 = arith.constant 3 : index
      %c0_88 = arith.constant 0 : index
      %c0_89 = arith.constant 0 : index
      %152 = vector.load %arg9[%c3_87, %c0_88, %c0_89] : memref<4x8x1xf32, #tpu.memory_space<vmem>>, vector<1x8x1xf32>
      %153 = vector.shape_cast %152 : vector<1x8x1xf32> to vector<8x1xf32>
      %cst_90 = arith.constant 1.000000e+00 : f32
      %154 = vector.broadcast %cst_90 : f32 to vector<8x1xf32>
      %155 = arith.divf %154, %153 : vector<8x1xf32>
      %156 = vector.shape_cast %155 : vector<8x1xf32> to vector<8x1xf32>
      %157 = vector.broadcast %156 : vector<8x1xf32> to vector<8x8xf32>
      %158 = tpu.concatenate %139, %145, %151, %157 in 1 : vector<8x8xf32>, vector<8x8xf32>, vector<8x8xf32>, vector<8x8xf32> -> vector<8x32xf32>
      %c0_91 = arith.constant 0 : index
      %c0_92 = arith.constant 0 : index
      %159 = vector.load %arg10[%c0_91, %c0_92] : memref<8x32xf32, #tpu.memory_space<vmem>>, vector<8x32xf32>
      %160 = arith.mulf %159, %158 : vector<8x32xf32>
      %c0_93 = arith.constant 0 : index
      %c0_94 = arith.constant 0 : index
      %c0_95 = arith.constant 0 : index
      %161 = vector.load %arg7[%c0_93, %c0_94, %c0_95] : memref<1x8x32xf32, #tpu.memory_space<vmem>>, vector<1x8x32xf32>
      %162 = vector.shape_cast %161 : vector<1x8x32xf32> to vector<8x32xf32>
      %163 = vector.shape_cast %160 : vector<8x32xf32> to vector<1x8x32xf32>
      tpu.vector_store %arg7[%c0_93, %c0_94, %c0_95], %163 {strides = array<i32>} : memref<1x8x32xf32, #tpu.memory_space<vmem>>, vector<1x8x32xf32>,
    } else {
    }
    return
  }
  func.func @transform_0(%arg0: i32, %arg1: i32, %arg2: i32, %arg3: i32) -> (i32, i32, i32) {
    %c0_i32 = arith.constant 0 : i32
    return %arg0, %arg2, %arg1 : i32, i32, i32
  }
  func.func @transform_1(%arg0: i32, %arg1: i32, %arg2: i32, %arg3: i32) -> (i32, i32, i32) {
    %c0_i32 = arith.constant 0 : i32
    %0 = arith.addi %arg1, %c0_i32 : i32
    %c0_i32_0 = arith.constant 0 : i32
    return %arg0, %arg3, %0 : i32, i32, i32
  }
  func.func @transform_2(%arg0: i32, %arg1: i32, %arg2: i32, %arg3: i32) -> (i32, i32, i32) {
    %c0_i32 = arith.constant 0 : i32
    %0 = arith.addi %arg1, %c0_i32 : i32
    %c0_i32_0 = arith.constant 0 : i32
    return %arg0, %arg3, %0 : i32, i32, i32
  }
  func.func @transform_3(%arg0: i32, %arg1: i32, %arg2: i32, %arg3: i32) -> (i32, i32, i32) {
    %c0_i32 = arith.constant 0 : i32
    return %arg0, %arg2, %arg1 : i32, i32, i32
  }
}

</mosaic_0001>

<bundles_post_ra>
// kernel: self_attention_gpt2.3
= control target key start
LH: loop header
LB: loop body
LE: loop exit
PB: predicated region body
PF: predicated region fallthrough
CT: control target
= control target key end

     0   :  { %vm29_vm0 = vcmask 261120   ;;  %vm18_vm1 = vcmask 785408   ;;  %v165_v3 = vmov 0.0   ;;  %s221_s1 = inlined_call_operand.vmem [shape: f32[32,96], index: 1, kind: input, shape index: {}]   ;;  %s222_s0 = inlined_call_operand.vmem [shape: f32[16,32], index: 0, kind: input, shape index: {}]   ;;  %s223_s2 = inlined_call_operand.vmem [shape: f32[1,96], index: 2, kind: input, shape index: {}]   ;;  %s224_s3 = inlined_call_operand.vmem [shape: f32[16,96], index: 3, kind: output, shape index: {}]  }
   0x1   :  { %v25_v0 = vld [vmem:[%s221_s1] sm:$0xff]  ;;  %v26_v1 = vld [vmem:[%s221_s1 + $0x8] sm:$0xff]  ;;  %v27_v2 = vld [vmem:[%s221_s1 + $0x10] sm:$0xff]  ;;  %20 = vst.msk [vmem:[#allocation2 + $0x8] sm:$0xff] %vm18_vm1, %v165_v3 }
   0x2   :  { %19 = vst.msk [vmem:[#allocation2] sm:$0xff] %vm18_vm1, %v165_v3  ;;  %v156_v4 = vpack.c.bf16 %v26_v1, %v25_v0  ;;  %v28_v5 = vld [vmem:[%s221_s1 + $0x18] sm:$0xff]  ;;  %v23_v6 = vld [vmem:[%s222_s0] sm:$0xff]  ;;  %v24_v8 = vld [vmem:[%s222_s0 + $0x8] sm:$0xff] }
   0x3   :  { %v160_v7 = vpack.c.bf16 %v28_v5, %v27_v2  ;;  %153 = vmatprep.mubr.msk.f32.mxu0 %vm29_vm0, %v23_v6  ;;  %v138_v15 = vld [vmem:[%s223_s2] ss:$0 sm:$0xff] }
   0x4   :  { %157 = vmatprep.subr.bf16.mxu0 %v156_v4 }
   0x5   :  { %159 = vmatpush3.bf16.msra.mxu0 %v156_v4 }
   0x6   :  { %161 = vmatprep.subr.bf16.mxu0 %v160_v7 }
   0x8   :  { %v22_v9 = vld [vmem:[#allocation2 + $0x8] sm:$0xff] }
   0x9   :  { %163 = vmatpush3.bf16.msra.mxu0 %v160_v7  ;;  %v21_v10 = vld [vmem:[#allocation2] sm:$0xff] }
   0xc   :  { %154 = vmatmul.mubr.msk.f32.vlgmr.msra.gmra.mrb[0].mxu0 %vm29_vm0, %v24_v8 }
  0xdf   :  { %v155_v11 = vpop.f32.mrb[0].mxu0 }
  0xe0   :  { %v112_v12 = vadd.f32 %v155_v11, %v22_v9  ;;  %v102_v13 = vpop.f32.mrb[1].mxu0 }
  0xe1   :  { %v111_v14 = vadd.f32 %v102_v13, %v21_v10 }
  0xe2   :  { %115 = vst.msk [vmem:[#allocation2 + $0x8] sm:$0xff] %vm18_vm1, %v112_v12 }
  0xe3   :  { %114 = vst.msk [vmem:[#allocation2] sm:$0xff] %vm18_vm1, %v111_v14 }
  0xe9   :  { %v120_v16 = vld [vmem:[#allocation2 + $0x8] sm:$0xff] }
  0xea   :  { %v129_v17 = vadd.f32 %v138_v15, %v120_v16  ;;  %v119_v18 = vld [vmem:[#allocation2] sm:$0xff] }
  0xeb   :  { %v128_v19 = vadd.f32 %v138_v15, %v119_v18 }
  0xec   :  { %131 = vst.msk [vmem:[%s224_s3 + $0x8] sm:$0xff] %vm18_vm1, %v129_v17 }
  0xed   :  { %130 = vst.msk [vmem:[%s224_s3] sm:$0xff] %vm18_vm1, %v128_v19 }

// kernel: self_attention_gpt2.5
= control target key start
LH: loop header
LB: loop body
LE: loop exit
PB: predicated region body
PF: predicated region fallthrough
CT: control target
= control target key end

     0   :  { %vm19_vm0 = vcmask 261120   ;;  %v204_v6 = vmov 0.0   ;;  %s269_s0 = inlined_call_operand.vmem [shape: f32[16,32], index: 0, kind: input, shape index: {}]   ;;  %s270_s1 = inlined_call_operand.vmem [shape: f32[32,32], index: 1, kind: input, shape index: {}]   ;;  %s271_s2 = inlined_call_operand.vmem [shape: f32[1,32], index: 2, kind: input, shape index: {}]   ;;  %s272_s3 = inlined_call_operand.hbm [shape: f32[16,32], index: 3, kind: output, shape index: {}]  }
   0x1   :  { %v26_v0 = vld [vmem:[%s270_s1] sm:$0xff]  ;;  %v27_v1 = vld [vmem:[%s270_s1 + $0x8] sm:$0xff]  ;;  %v28_v2 = vld [vmem:[%s270_s1 + $0x10] sm:$0xff]  ;;  %21 = vst.msk [vmem:[#allocation2 + $0x8] sm:$0xff] %vm19_vm0, %v204_v6 }
   0x2   :  { %v168_v3 = vpack.c.bf16 %v27_v1, %v26_v0  ;;  %v29_v4 = vld [vmem:[%s270_s1 + $0x18] sm:$0xff]  ;;  %v24_v5 = vld [vmem:[%s269_s0] sm:$0xff]  ;;  %20 = vst.msk [vmem:[#allocation2] sm:$0xff] %vm19_vm0, %v204_v6 }
   0x3   :  { %v172_v7 = vpack.c.bf16 %v29_v4, %v28_v2  ;;  %165 = vmatprep.mubr.msk.f32.mxu0 %vm19_vm0, %v24_v5 }
   0x4   :  { %8 = vsyncpa [#allocation4], 0  ;;  %169 = vmatprep.subr.bf16.mxu0 %v168_v3  ;;  %v25_v8 = vld [vmem:[%s269_s0 + $0x8] sm:$0xff]  ;;  %v150_v15 = vld [vmem:[%s271_s2] ss:$0 sm:$0xff]  ;;  %s205_s25 = smov [#allocation3]  }
   0x5   :  { %171 = vmatpush3.bf16.msra.mxu0 %v168_v3  ;;  %s137_s26 = sshll.u32 %s205_s25, 4  ;;  %s138_s26 = int_to_ptr.vmem [resolvable:$true] %s137_s26 }
   0x6   :  { %173 = vmatprep.subr.bf16.mxu0 %v172_v7  ;;  %s180_s0 = scalar_lea.vmem %s138_s26, 256  ;;  %p185_p1 = scmp.lt.s32.totalorder %s138_s26, %s138_s26 }
   0x7   :  { %p181_p0 = scmp.ne.s32.totalorder %s138_s26, %s180_s0  ;;  %p186_p2 = scmp.lt.s32.totalorder %s180_s0, %s180_s0 }
   0x8   :  { %v23_v9 = vld [vmem:[#allocation2 + $0x8] sm:$0xff] }
   0x9   :  { %175 = vmatpush3.bf16.msra.mxu0 %v172_v7  ;;  %v22_v10 = vld [vmem:[#allocation2] sm:$0xff]  ;;  %p187_p3 = por %p186_p2, %p185_p1 }
   0xb   :  { %p188_p4 = pnand %p187_p3, %p181_p0 }
   0xc   :  { %166 = vmatmul.mubr.msk.f32.vlgmr.msra.gmra.mrb[0].mxu0 %vm19_vm0, %v25_v8 }
  0xdf   :  { %v167_v11 = vpop.f32.mrb[0].mxu0 }
  0xe0   :  { %v113_v12 = vadd.f32 %v167_v11, %v23_v9  ;;  %v103_v13 = vpop.f32.mrb[1].mxu0 }
  0xe1   :  { %v112_v14 = vadd.f32 %v103_v13, %v22_v10 }
  0xe2   :  { %115 = vst.msk [vmem:[#allocation2 + $0x8] sm:$0xff] %vm19_vm0, %v113_v12 }
  0xe3   :  { %114 = vst.msk [vmem:[#allocation2] sm:$0xff] %vm19_vm0, %v112_v14 }
  0xe9   :  { %v120_v16 = vld [vmem:[#allocation2 + $0x8] sm:$0xff] }
  0xea   :  { %v119_v17 = vld [vmem:[#allocation2] sm:$0xff]  ;;  %v129_v18 = vadd.f32 %v150_v15, %v120_v16 }
  0xeb   :  { %v128_v19 = vadd.f32 %v150_v15, %v119_v17 }
  0xec   :  { %131 = vst.msk [vmem:[#allocation3 + $0x8] sm:$0xff] %vm19_vm0, %v129_v18 }
  0xed   :  { %130 = vst.msk [vmem:[#allocation3] sm:$0xff] %vm19_vm0, %v128_v19 }
  0xee   :  { %191 = shalt.err (!%p188_p4)
}
  0xef   :  { %s192_s28 = scalar_lea.hbm %s272_s3, 256 }
  0xf0   :  { %p193_p5 = scmp.ne.s32.totalorder %s272_s3, %s192_s28  ;;  %p196_p6 = scmp.lt.u32.totalorder %s192_s28, %s272_s3 }
  0xf2   :  { %p198_p7 = pnand %p196_p6, %p193_p5 }
  0xf4   :  { %201 = shalt.err (!%p198_p7)
}
  0xf5   :  { %s206_s6 = smov 128   ;;  %s207_s7 = smov 8  }
  0xf6   :  { %143 = dma.vmem_to_hbm [thread:$0]  %s138_s26, 256, %s272_s3, [#allocation4], %s206_s6, %s206_s6, %s207_s7  }
  0xf7   :  { %202 = dma.done.wait [#allocation4], 256  }
  0xf8   :  { %203 = vsyncadd [#allocation4], 4294967040 }
  0xf9   :  { %147 = vsyncpa [#allocation4], 1 }

// kernel: self_attention_gpt2.4
= control target key start
LH: loop header
LB: loop body
LE: loop exit
PB: predicated region body
PF: predicated region fallthrough
CT: control target
= control target key end

     0   :  { %s1450_s12 = smov 0   ;;  %s1452_s13 = smov 0   ;;  %s1596_s0 = inlined_call_operand.vmem [shape: f32[2,8,32], index: 0, kind: input, shape index: {}]   ;;  %s1597_s1 = inlined_call_operand.vmem [shape: f32[2,8,32], index: 1, kind: input, shape index: {}]   ;;  %s1598_s2 = inlined_call_operand.vmem [shape: f32[2,8,32], index: 2, kind: input, shape index: {}]   ;;  %s1599_s3 = inlined_call_operand.vmem [shape: f32[2,8,32], index: 3, kind: output, shape index: {}]  }
   0x1   :  { %s1454_s14 = smov 0  }
   0x2 LB: > { %s39_s15 = sadd.s32 1, %s1414_s13  ;;  %p1261_p0 = scmp.ge.s32.totalorder %s1418_s14, 1  ;;  %s1418_s14 = sphi %s1454_s14, %s13_s14   ;;  %s1414_s13 = sphi %s1452_s13, %s1601_s13   ;;  %s1410_s12 = sphi %s1450_s12, %s1600_s12  }
   0x3   : > { %p41_p1 = scmp.ge.s32.totalorder %s39_s15, 2  ;;  %p214_p2 = scmp.lt.s32.totalorder %s1418_s14, 3 }
   0x5   : > { %s1603_s15 = smov (%p41_p1, %s39_s15), 0  ;;  %p215_p3 = pnand %p1261_p0, %p214_p2 }
   0x6   : > { %p268_p4 = scmp.lt.s32.totalorder (!%p215_p3), %s1410_s12, 1  ;;  %v1420_v0 = vmov (!%p215_p3), 0.0   ;;  %vm1421_vm0 = vmmov (!%p215_p3), 0   ;;  %vm326_vm1 = vcmask (!%p215_p3), 64512   ;;  %vm312_vm2 = vcmask (!%p215_p3), 7168   ;;  %s1424_s23 = smov (!%p215_p3), 120  }
   0x7   : > { %218 = sbr.rel (%p215_p3) target bundleno = 1381 (0x565), region = 32  ;;  %1296 = vmatprep.subr.mxu0 (!%p215_p3), %v1420_v0  ;;  %1298 = vmatprep.mubr.msk.f32.mxu0 (!%p215_p3), %vm1421_vm0, %v1420_v0  ;;  %v1422_v3 = vmov (!%p215_p3), -inf   ;;  %317 = vst.msk [vmem:[#allocation3] sm:$0xff] (!%p215_p3), %vm312_vm2, %v1420_v0  ;;  %318 = vst.msk [vmem:[#allocation3 + $0x8] sm:$0xff] (!%p215_p3), %vm312_vm2, %v1420_v0  ;;  %v1423_v7 = vmov (!%p215_p3), 0   ;;  %s1425_s24 = smov (!%p215_p3), 112  }
   0x8   : > { %1301 = vmatprep.subr.mxu1 (!%p215_p3), %v1420_v0  ;;  %1303 = vmatprep.mubr.msk.f32.mxu1 (!%p215_p3), %vm1421_vm0, %v1420_v0  ;;  %313 = vst.msk [vmem:[#allocation2] sm:$0xff] (!%p215_p3), %vm312_vm2, %v1422_v3  ;;  %314 = vst.msk [vmem:[#allocation2 + $0x8] sm:$0xff] (!%p215_p3), %vm312_vm2, %v1422_v3  ;;  %s1426_s25 = smov (!%p215_p3), 104   ;;  %vm321_vm3 = vcmask (!%p215_p3), 261120   ;;  %s1427_s29 = smov (!%p215_p3), 8   ;;  %vm1063_vm4 = vcmask (!%p215_p3), 130048  }
   0x9   : > { %315 = vst.msk [vmem:[#allocation2 + $0x10] sm:$0xff] (!%p215_p3), %vm312_vm2, %v1422_v3  ;;  %316 = vst.msk [vmem:[#allocation2 + $0x18] sm:$0xff] (!%p215_p3), %vm312_vm2, %v1422_v3  ;;  %1370 = vset.pattern.permute.xlu0 (!%p215_p3), %v1423_v7  ;;  %1371 = vset.pattern.permute.xlu1 (!%p215_p3), %v1423_v7  ;;  %s1428_s30 = smov (!%p215_p3), 16   ;;  %s1429_s4 = smov (!%p215_p3), 24   ;;  %vm1065_vm5 = vcmask (!%p215_p3), 195584  }
   0xa   : > { %319 = vst.msk [vmem:[#allocation3 + $0x10] sm:$0xff] (!%p215_p3), %vm312_vm2, %v1420_v0  ;;  %320 = vst.msk [vmem:[#allocation3 + $0x18] sm:$0xff] (!%p215_p3), %vm312_vm2, %v1420_v0 }
   0xb   : > { %322 = vst.msk [vmem:[#allocation4] sm:$0xff] (!%p215_p3), %vm321_vm3, %v1420_v0 }
   0xe   : > { %s1605_s12 = smov (!%p268_p4, %s1410_s12), 1 }
   0xf   : > { %s1474_s16 = sshll.u32 %s1605_s12, 3  ;;  %v1508_v8 = vld [vmem:[#allocation2] sm:$0xff]  ;;  %v585_v34 = vld [vmem:[#allocation2 + $0x8] sm:$0xff] }
  0x10   : > { %s287_s19 = scalar_lea.vmem %s1597_s1, %s1474_s16  ;;  %s277_s22 = scalar_lea.vmem %s1596_s0, %s1474_s16  ;;  %v771_v37 = vld [vmem:[#allocation2 + $0x10] sm:$0xff]  ;;  %v956_v41 = vld [vmem:[#allocation2 + $0x18] sm:$0xff] }
  0x11   : > { %v324_v1 = vld [vmem:[%s287_s19] sm:$0xff]  ;;  %s297_s28 = scalar_lea.vmem %s1598_s2, %s1474_s16  ;;  %s307_s7 = scalar_lea.vmem %s1599_s3, %s1474_s16 }
  0x12   : > { %1297 = vmatpush3.xpose.msk.msra.mxu0 %vm326_vm1, %v324_v1  ;;  %v323_v2 = vld [vmem:[%s277_s22] sm:$0xff]  ;;  %508 = vrot.lane.b32.xlu1 %v324_v1, %s1424_s23 }
  0x13   : > { %1311 = vmatprep.subr.mxu0 %v1420_v0  ;;  %v325_v12 = vld [vmem:[%s297_s28] sm:$0xff] }
  0x14   : > { %1302 = vmatpush3.msra.mxu1 %v325_v12 }
  0x15   : > { %1299 = vmatmul.mubr.msk.f32.vlgmr.msra.gmra.mrb[0].mxu0 %vm326_vm1, %v323_v2  ;;  %1306 = vmatprep.subr.mxu1 %v1420_v0 }
  0x16   : > { %1313 = vmatprep.mubr.msk.f32.mxu0 %vm1421_vm0, %v1420_v0  ;;  %506 = vrot.lane.b32.xlu1 %v323_v2, %s1424_s23 }
  0x1a   : > { %694 = vrot.lane.b32.xlu1 %v324_v1, %s1425_s24 }
  0x1e   : > { %692 = vrot.lane.b32.xlu1 %v323_v2, %s1425_s24 }
  0x22   : > { %879 = vrot.lane.b32.xlu1 %v324_v1, %s1426_s25 }
  0x26   : > { %877 = vrot.lane.b32.xlu1 %v323_v2, %s1426_s25 }
  0x84   : > { %v509_v13 = vpop.permute.xlu1 %508 }
  0x88   : > { %v507_v16 = vpop.permute.xlu1 %506 }
  0x8c   : > { %v695_v18 = vpop.permute.xlu1 %694 }
  0x90   : > { %v693_v19 = vpop.permute.xlu1 %692 }
  0x94   : > { %v880_v21 = vpop.permute.xlu1 %879 }
  0x98   : > { %v878_v22 = vpop.permute.xlu1 %877 }
  0xe8   : > { %v399_v4 = vpop.f32.mrb[0].mxu0 }
  0xe9   : > { %v1300_v5 = vpop.f32.mrb[1].mxu0  ;;  %v404_v6 = vsel %vm326_vm1, %v399_v4, -inf }
  0xea   : > { %405 = vmax.xlane.f32.xlu0 %v404_v6 }
 0x177   : > { %v406_v9 = vpop.xlane.xlu0 %405 }
 0x178   : > { %v1511_v10 = vmax.f32 %v1508_v8, %v406_v9 }
 0x17a   : > { %v408_v11 = vsub.f32 %v1508_v8, %v1511_v10  ;;  %427 = vst.msk [vmem:[#allocation2] sm:$0xff] %vm312_vm2, %v1511_v10  ;;  %413 = vperm.xlu0 %1370, %v1511_v10  }
 0x1f9   : > { %v414_v14 = vpop.permute.xlu0 %413 }
 0x1fa   : > { %v416_v15 = vsub.f32 %v399_v4, %v414_v14  ;;  %v409_v4 = vmul.f32 1.442695, %v408_v11 }
 0x1fc   : > { %v417_v17 = vmul.f32 1.442695, %v416_v15 }
 0x1fe   : > { %1372 = vpow2.f32 %v417_v17 }
 0x208   : > { %v1373_v20 = vpop.eup %1372 }
 0x209   : > { %1304 = vmatmul.mubr.msk.f32.vlgmr.msra.gmra.mrb[0].mxu1 %vm326_vm1, %v1373_v20  ;;  %v421_v46 = vsel %vm326_vm1, %v1373_v20, 0.0 }
 0x20a   : > { %1307 = vmatpush3.xpose.msk.msra.mxu1 %vm326_vm1, %v509_v13  ;;  %1308 = vmatprep.mubr.msk.f32.mxu1 %vm1421_vm0, %v1420_v0  ;;  %v419_v13 = vld [vmem:[#allocation3] sm:$0xff] }
 0x20b   : > { %1316 = vmatprep.subr.mxu1 %v1420_v0 }
 0x20d   : > { %1309 = vmatmul.mubr.msk.f32.vlgmr.msra.gmra.mrb[2].mxu1 %vm326_vm1, %v507_v16  ;;  %v602_v16 = vld [vmem:[#allocation3 + $0x8] sm:$0xff] }
 0x20e   : > { %1317 = vmatpush3.xpose.msk.msra.mxu1 %vm326_vm1, %v695_v18  ;;  %1318 = vmatprep.mubr.msk.f32.mxu1 %vm1421_vm0, %v1420_v0 }
 0x20f   : > { %1326 = vmatprep.subr.mxu1 %v1420_v0 }
 0x211   : > { %1319 = vmatmul.mubr.msk.f32.vlgmr.msra.gmra.mrb[4].mxu1 %vm326_vm1, %v693_v19  ;;  %v788_v19 = vld [vmem:[#allocation3 + $0x10] sm:$0xff] }
 0x212   : > { %1327 = vmatpush3.xpose.msk.msra.mxu1 %vm326_vm1, %v880_v21  ;;  %1328 = vmatprep.mubr.msk.f32.mxu1 %vm1421_vm0, %v1420_v0 }
 0x215   : > { %1329 = vmatmul.mubr.msk.f32.vlgmr.msra.gmra.mrb[6].mxu1 %vm326_vm1, %v878_v22  ;;  %v973_v22 = vld [vmem:[#allocation3 + $0x18] sm:$0xff] }
 0x2dc   : > { %v1538_v23 = vpop.f32.mrb[0].mxu1 }
 0x2dd   : > { %v1305_v24 = vpop.f32.mrb[1].mxu1 }
 0x2e0   : > { %v580_v25 = vpop.f32.mrb[2].mxu1 }
 0x2e1   : > { %v1310_v26 = vpop.f32.mrb[3].mxu1  ;;  %v586_v27 = vsel %vm326_vm1, %v580_v25, -inf }
 0x2e2   : > { %587 = vmax.xlane.f32.xlu1 %v586_v27 }
 0x2e4   : > { %v766_v28 = vpop.f32.mrb[4].mxu1 }
 0x2e5   : > { %v1320_v29 = vpop.f32.mrb[5].mxu1  ;;  %v772_v30 = vsel %vm326_vm1, %v766_v28, -inf }
 0x2e6   : > { %773 = vmax.xlane.f32.xlu0 %v772_v30 }
 0x2e8   : > { %v951_v31 = vpop.f32.mrb[6].mxu1 }
 0x2e9   : > { %v1330_v32 = vpop.f32.mrb[7].mxu1  ;;  %v957_v33 = vsel %vm326_vm1, %v951_v31, -inf }
 0x2ea   : > { %958 = vmax.xlane.f32.xlu1 %v957_v33 }
 0x36f   : > { %v588_v35 = vpop.xlane.xlu1 %587 }
 0x370   : > { %v589_v36 = vmax.f32 %v585_v34, %v588_v35 }
 0x372   : > { %v590_v38 = vsub.f32 %v585_v34, %v589_v36  ;;  %609 = vst.msk [vmem:[#allocation2 + $0x8] sm:$0xff] %vm312_vm2, %v589_v36  ;;  %595 = vperm.xlu1 %1371, %v589_v36  }
 0x373   : > { %v774_v39 = vpop.xlane.xlu0 %773 }
 0x374   : > { %v775_v40 = vmax.f32 %v771_v37, %v774_v39  ;;  %v591_v1 = vmul.f32 1.442695, %v590_v38 }
 0x376   : > { %v776_v42 = vsub.f32 %v771_v37, %v775_v40  ;;  %795 = vst.msk [vmem:[#allocation2 + $0x10] sm:$0xff] %vm312_vm2, %v775_v40  ;;  %781 = vperm.xlu0 %1370, %v775_v40  }
 0x377   : > { %v959_v43 = vpop.xlane.xlu1 %958 }
 0x378   : > { %v960_v44 = vmax.f32 %v956_v41, %v959_v43  ;;  %v777_v5 = vmul.f32 1.442695, %v776_v42 }
 0x37a   : > { %v961_v45 = vsub.f32 %v956_v41, %v960_v44  ;;  %980 = vst.msk [vmem:[#allocation2 + $0x18] sm:$0xff] %vm312_vm2, %v960_v44  ;;  %966 = vperm.xlu1 %1371, %v960_v44  }
 0x37c   : > { %v962_v3 = vmul.f32 1.442695, %v961_v45 }
 0x37e   : > { %611 = vrot.lane.b32.xlu1 %v325_v12, %s1424_s23 }
 0x382   : > { %796 = vrot.lane.b32.xlu1 %v325_v12, %s1425_s24 }
 0x386   : > { %981 = vrot.lane.b32.xlu1 %v325_v12, %s1426_s25 }
 0x3aa   : > { %422 = vadd.xlane.f32.xlu1 %v421_v46 }
 0x3f1   : > { %v596_v47 = vpop.permute.xlu1 %595 }
 0x3f2   : > { %v598_v48 = vsub.f32 %v580_v25, %v596_v47 }
 0x3f4   : > { %v599_v49 = vmul.f32 1.442695, %v598_v48 }
 0x3f5   : > { %v782_v50 = vpop.permute.xlu0 %781 }
 0x3f6   : > { %1374 = vpow2.f32 %v599_v49  ;;  %v784_v51 = vsub.f32 %v766_v28, %v782_v50 }
 0x3f8   : > { %v785_v52 = vmul.f32 1.442695, %v784_v51  ;;  %v1082_v51 = vld [vmem:[#allocation4] sm:$0xff] }
 0x3f9   : > { %v967_v53 = vpop.permute.xlu1 %966 }
 0x3fa   : > { %1376 = vpow2.f32 %v785_v52  ;;  %v969_v54 = vsub.f32 %v951_v31, %v967_v53 }
 0x3fc   : > { %v970_v55 = vmul.f32 1.442695, %v969_v54 }
 0x3fd   : > { %v612_v56 = vpop.permute.xlu1 %611 }
 0x3fe   : > { %1378 = vpow2.f32 %v970_v55  ;;  %1312 = vmatpush3.msra.mxu0 %v612_v56 }
 0x3ff   : > { %1321 = vmatprep.subr.mxu0 %v1420_v0  ;;  %1380 = vpow2.f32 %v591_v1 }
 0x400   : > { %v1375_v57 = vpop.eup %1374  ;;  %1382 = vpow2.f32 %v962_v3 }
 0x401   : > { %1314 = vmatmul.mubr.msk.f32.vlgmr.msra.gmra.mrb[2].mxu0 %vm326_vm1, %v1375_v57  ;;  %v797_v58 = vpop.permute.xlu1 %796  ;;  %v604_v59 = vsel %vm326_vm1, %v1375_v57, 0.0  ;;  %1384 = vpow2.f32 %v409_v4 }
 0x402   : > { %605 = vadd.xlane.f32.xlu0 %v604_v59  ;;  %1322 = vmatpush3.msra.mxu0 %v797_v58  ;;  %1386 = vpow2.f32 %v777_v5 }
 0x403   : > { %1323 = vmatprep.mubr.msk.f32.mxu0 %vm1421_vm0, %v1420_v0  ;;  %1331 = vmatprep.subr.mxu0 %v1420_v0 }
 0x404   : > { %v1377_v60 = vpop.eup %1376 }
 0x405   : > { %1324 = vmatmul.mubr.msk.f32.vlgmr.msra.gmra.mrb[4].mxu0 %vm326_vm1, %v1377_v60  ;;  %v982_v61 = vpop.permute.xlu1 %981  ;;  %v790_v62 = vsel %vm326_vm1, %v1377_v60, 0.0 }
 0x406   : > { %1332 = vmatpush3.msra.mxu0 %v982_v61  ;;  %791 = vadd.xlane.f32.xlu1 %v790_v62 }
 0x407   : > { %1333 = vmatprep.mubr.msk.f32.mxu0 %vm1421_vm0, %v1420_v0 }
 0x408   : > { %v1379_v63 = vpop.eup %1378 }
 0x409   : > { %1334 = vmatmul.mubr.msk.f32.vlgmr.msra.gmra.mrb[6].mxu0 %vm326_vm1, %v1379_v63  ;;  %v975_v2 = vsel %vm326_vm1, %v1379_v63, 0.0  ;;  %v1381_v6 = vpop.eup %1380 }
 0x40a   : > { %976 = vadd.xlane.f32.xlu0 %v975_v2  ;;  %v1383_v7 = vpop.eup %1382  ;;  %v603_v17 = vmul.f32 %v1381_v6, %v602_v16 }
 0x40b   : > { %v1385_v9 = vpop.eup %1384  ;;  %v974_v25 = vmul.f32 %v1383_v7, %v973_v22 }
 0x40c   : > { %v1387_v12 = vpop.eup %1386  ;;  %v420_v14 = vmul.f32 %v1385_v9, %v419_v13 }
 0x40d   : > { %v789_v0 = vmul.f32 %v1387_v12, %v788_v19 }
 0x417   : > { %689 = vperm.xlu1 %1371, %v1381_v6  }
 0x41b   : > { %1059 = vperm.xlu1 %1371, %v1383_v7  }
 0x420   : > { %503 = vperm.xlu0 %1370, %v1385_v9  }
 0x424   : > { %874 = vperm.xlu0 %1370, %v1387_v12  }
 0x437   : > { %v423_v15 = vpop.xlane.xlu1 %422 }
 0x438   : > { %v424_v8 = vadd.f32 %v423_v15, %v420_v14 }
 0x43a   : > { %426 = vst.msk [vmem:[#allocation3] sm:$0xff] %vm312_vm2, %v424_v8 }
 0x441   : > { %v1090_v10 = vld [vmem:[#allocation3] sm:$0xff] }
 0x442   : > { %1388 = vrcp.f32 %v1090_v10 }
 0x44c   : > { %v1389_v11 = vpop.eup %1388 }
 0x44d   : > { %1095 = vperm.xlu0 %1370, %v1389_v11  }
 0x48f   : > { %v606_v18 = vpop.xlane.xlu0 %605 }
 0x490   : > { %v607_v20 = vadd.f32 %v606_v18, %v603_v17 }
 0x492   : > { %608 = vst.msk [vmem:[#allocation3 + $0x8] sm:$0xff] %vm312_vm2, %v607_v20 }
 0x493   : > { %v792_v21 = vpop.xlane.xlu1 %791 }
 0x494   : > { %v793_v24 = vadd.f32 %v792_v21, %v789_v0 }
 0x496   : > { %794 = vst.msk [vmem:[#allocation3 + $0x10] sm:$0xff] %vm312_vm2, %v793_v24 }
 0x497   : > { %v977_v26 = vpop.xlane.xlu0 %976  ;;  %v690_v40 = vpop.permute.xlu1 %689 }
 0x498   : > { %v978_v27 = vadd.f32 %v977_v26, %v974_v25 }
 0x499   : > { %v1098_v28 = vld [vmem:[#allocation3 + $0x8] sm:$0xff] }
 0x49a   : > { %979 = vst.msk [vmem:[#allocation3 + $0x18] sm:$0xff] %vm312_vm2, %v978_v27  ;;  %1390 = vrcp.f32 %v1098_v28 }
 0x49b   : > { %v1060_v42 = vpop.permute.xlu1 %1059 }
 0x49d   : > { %v1106_v30 = vld [vmem:[#allocation3 + $0x10] sm:$0xff] }
 0x49e   : > { %1392 = vrcp.f32 %v1106_v30 }
 0x49f   : > { %v504_v41 = vpop.permute.xlu0 %503 }
 0x4a0   : > { %v1062_v45 = vsel %vm326_vm1, %v504_v41, %v690_v40 }
 0x4a1   : > { %v1114_v31 = vld [vmem:[#allocation3 + $0x18] sm:$0xff] }
 0x4a2   : > { %1394 = vrcp.f32 %v1114_v31 }
 0x4a3   : > { %v875_v43 = vpop.permute.xlu0 %874 }
 0x4a4   : > { %v1391_v29 = vpop.eup %1390  ;;  %v1064_v47 = vsel %vm1063_vm4, %v1062_v45, %v875_v43 }
 0x4a5   : > { %1103 = vperm.xlu1 %1371, %v1391_v29   ;;  %v1066_v49 = vsel %vm1065_vm5, %v1064_v47, %v1060_v42 }
 0x4a6   : > { %v1083_v54 = vmul.f32 %v1082_v51, %v1066_v49 }
 0x4a8   : > { %v1393_v36 = vpop.eup %1392 }
 0x4ac   : > { %v1395_v39 = vpop.eup %1394 }
 0x4cc   : > { %v1096_v46 = vpop.permute.xlu0 %1095 }
 0x4d4   : > { %v683_v32 = vpop.f32.mrb[2].mxu0 }
 0x4d5   : > { %1068 = vrot.lane.b32.xlu1 %v683_v32, %s1427_s29  ;;  %v1315_v33 = vpop.f32.mrb[3].mxu0 }
 0x4d8   : > { %v868_v34 = vpop.f32.mrb[4].mxu0 }
 0x4d9   : > { %1072 = vrot.lane.b32.xlu0 %v868_v34, %s1428_s30  ;;  %v1325_v35 = vpop.f32.mrb[5].mxu0 }
 0x4dc   : > { %v1053_v37 = vpop.f32.mrb[6].mxu0 }
 0x4dd   : > { %1111 = vperm.xlu0 %1370, %v1393_v36   ;;  %1076 = vrot.lane.b32.xlu1 %v1053_v37, %s1429_s4  ;;  %v1335_v38 = vpop.f32.mrb[7].mxu0 }
 0x4e1   : > { %1119 = vperm.xlu1 %1371, %v1395_v39  }
 0x524   : > { %v1104_v44 = vpop.permute.xlu1 %1103 }
 0x525   : > { %v1122_v59 = vsel %vm326_vm1, %v1096_v46, %v1104_v44 }
 0x547   : > { %v1069_v48 = vpop.permute.xlu1 %1068 }
 0x548   : > { %v1079_v52 = vsel %vm326_vm1, %v1538_v23, %v1069_v48 }
 0x54b   : > { %v1073_v50 = vpop.permute.xlu0 %1072 }
 0x54c   : > { %v1080_v53 = vsel %vm1063_vm4, %v1079_v52, %v1073_v50 }
 0x54f   : > { %v1077_v55 = vpop.permute.xlu1 %1076 }
 0x550   : > { %v1081_v56 = vsel %vm1065_vm5, %v1080_v53, %v1077_v55 }
 0x551   : > { %v1084_v57 = vadd.f32 %v1083_v54, %v1081_v56 }
 0x553   : > { %1086 = vst.msk [vmem:[#allocation4] sm:$0xff] %vm321_vm3, %v1084_v57 }
 0x55a   : > { %v1125_v23 = vld [vmem:[#allocation4] sm:$0xff] }
 0x55c   : > { %v1112_v58 = vpop.permute.xlu0 %1111 }
 0x55d   : > { %v1123_v60 = vsel %vm1063_vm4, %v1122_v59, %v1112_v58 }
 0x560   : > { %v1120_v61 = vpop.permute.xlu1 %1119 }
 0x561   : > { %v1124_v62 = vsel %vm1065_vm5, %v1123_v60, %v1120_v61 }
 0x562   : > { %v1126_v63 = vmul.f32 %v1125_v23, %v1124_v62 }
 0x564   : > { %1127 = vst.msk [vmem:[%s307_s7] sm:$0xff] %vm321_vm3, %v1126_v63 }
 0x565 PF: > { %s13_s14 = sadd.s32 1, %s1418_s14   ;;  %s1600_s12 = smov %s1414_s13 }
 0x566   : > { %p10_p5 = scmp.ge.s32.totalorder %s13_s14, 4   ;;  %s1601_s13 = smov %s1603_s15 }
 0x568   :  { %12 = sbr.rel (!%p10_p5) target bundleno = 2 (0x2), region = 82 }

</bundles_post_ra>
